<compile_context>
chip_gen: v7x
topology: tpu7x:2x2x1
jax: 0.10.0
libtpu: 0.0.40
codegen_flags: <defaults>
</compile_context>

<pallas_src>
import functools

import jax
import jax.numpy as jnp
from jax.experimental import pallas as pl
from jax.experimental.pallas import tpu as pltpu


def _spiking_tanh_kernel(tj_ref, w_ref, b_ref, o_ref, *, t_min, units):
    """Fused hot path: one half-width matmul + exact folded epilogue.

    tj_ref: (TB, K)   batch tile of input spike times
    w_ref:  (K, U)    weights.T (half-width kernel, no bias row)
    b_ref:  (1, U)    biases
    o_ref:  (TB, 2U)  combined output (out1 - out2)
    """
    # TODO(synk): assumes D_i == 0 (its init value) and noise == 0; if D_i becomes
    # a trained nonzero parameter the full two-kernel formulation must return.
    x = tj_ref[...] - t_min                                            # (TB, K)
    s = jnp.dot(x, w_ref[...], preferred_element_type=jnp.float32)     # (TB, U)
    s = s - b_ref[...]                                                 # broadcast (1, U)
    # Exact identity: out1 - out2 = [clip(s, -1, 0), clip(-s, -1, 0)]
    # TODO(synk): SubSNNLayer source was not provided; best-effort elementwise
    # combination out1 - out2 of the two spike-time streams.
    o_ref[:, :units] = jnp.clip(s, -1.0, 0.0)    # lane-aligned (128-multiple) store
    o_ref[:, units:] = jnp.clip(-s, -1.0, 0.0)   # lane-aligned (128-multiple) store


def prepare_spiking_tanh_params(weights, biases):
    """One-time parameter packing (hoisted out of the per-call path).

    Returns (weights.T as (K, U) f32, biases as (1, U) f32). No bias-row append,
    no sublane padding: the bias is handled as a separate VMEM operand so the
    per-call tj concatenate disappears entirely.
    """
    w_t = weights.T.astype(jnp.float32)              # (K, U)
    b = biases.astype(jnp.float32).reshape(1, -1)    # (1, U)
    return w_t, b


def spiking_dense_positive_tanh(tj, w_t, b, *, t_min=0.0, t_max=1.0, batch_block=8):
    """Forward pass of SpikingDense_positive_tanH (batched).

    tj:  (B, input_units) spike times of the previous layer.
         (The torch forward hard-codes B=1 via its bias-spike concat; per-row
          semantics are identical, so B >= 1 rows are processed per call.)
    w_t: (input_units, units) weights.T   (from prepare_spiking_tanh_params)
    b:   (1, units) biases                (from prepare_spiking_tanh_params)
    """
    del t_max  # folds out exactly in the out1 - out2 combination (D_i = 0)
    k, units = w_t.shape
    bsz, k_in = tj.shape
    assert k_in == k
    tb = batch_block if bsz >= batch_block else bsz
    grid = (pl.cdiv(bsz, tb),)

    kernel = functools.partial(_spiking_tanh_kernel, t_min=float(t_min), units=units)
    return pl.pallas_call(
        kernel,
        out_shape=jax.ShapeDtypeStruct((bsz, 2 * units), jnp.float32),
        grid=grid,
        in_specs=[
            pl.BlockSpec((tb, k), lambda i: (i, 0)),       # batch tile of tj
            pl.BlockSpec((k, units), lambda i: (0, 0)),    # weights, broadcast
            pl.BlockSpec((1, units), lambda i: (0, 0)),    # biases, broadcast
        ],
        out_specs=pl.BlockSpec((tb, 2 * units), lambda i: (i, 0)),
        compiler_params=pltpu.CompilerParams(
            dimension_semantics=("parallel",),             # engage 2nd TC on v7x
        ),
    )(tj.astype(jnp.float32), w_t, b)


def _reference(tj, weights, biases, t_min=0.0, t_max=1.0):
    """Plain-JAX transcription of the PyTorch forward (noise=0, D_i=0)."""
    W = jnp.concatenate((weights.T, -weights.T), axis=1)
    b1 = jnp.concatenate((biases, -biases))
    b2 = jnp.concatenate((biases, -biases)) - 1.0
    k1 = jnp.concatenate((W, b1[None, :]), axis=0)
    k2 = jnp.concatenate((W, b2[None, :]), axis=0)
    tj_ext = jnp.concatenate(
        (tj, jnp.full((tj.shape[0], 1), t_min - 1.0, tj.dtype)), axis=1
    )

    def call_spiking(x, kmat):
        thr = t_max - t_min  # D_i = 0
        ti = (x - t_min) @ kmat + thr + t_min
        return jnp.where(ti < t_max, ti, t_max)

    out1 = call_spiking(tj_ext, k1)
    out2 = call_spiking(tj_ext, k2)
    return out1 - out2


if __name__ == "__main__":
    units = 128          # -> 2*units = 256 output features (two lane-aligned halves)
    input_units = 32     # contraction dim, already a multiple of 8
    batch = 16           # 2 batch tiles of 8 rows: fills f32 sublanes, exercises grid

    key = jax.random.PRNGKey(0)
    kw, kb, kt = jax.random.split(key, 3)
    weights = 0.1 * jax.random.normal(kw, (units, input_units), dtype=jnp.float32)
    biases = 0.1 * jax.random.normal(kb, (units,), dtype=jnp.float32)
    # spiking times of the previous (positive-coded) layer
    tj = jax.random.uniform(kt, (batch, input_units), dtype=jnp.float32)

    # Parameter packing happens once, outside the per-call hot path.
    w_t, b = jax.block_until_ready(prepare_spiking_tanh_params(weights, biases))

    out = spiking_dense_positive_tanh(tj, w_t, b)
    out = jax.block_until_ready(out)

    ref = _reference(tj, weights, biases)
    assert out.shape == (batch, 2 * units)
    assert jnp.allclose(out, ref, atol=1e-5, rtol=1e-5), "mismatch vs reference"
    print("KERNEL_OK")
</pallas_src>

<mosaic_0001>
module attributes {stable_mosaic.version = 11 : i64} {
  func.func @_spiking_tanh_kernel(%arg0: i32, %arg1: memref<8x32xf32, #tpu.memory_space<vmem>>, %arg2: memref<32x128xf32, #tpu.memory_space<vmem>>, %arg3: memref<1x128xf32, #tpu.memory_space<vmem>>, %arg4: memref<8x256xf32, #tpu.memory_space<vmem>>) attributes {dimension_semantics = [#tpu.dimension_semantics<parallel>], iteration_bounds = array<i64: 2>, scalar_prefetch = 0 : i64, scratch_operands = 0 : i64, tpu.core_type = #tpu.core_type<tc>, window_params = [{transform_indices = @transform_0, window_bounds = array<i64: 8, 32>}, {pipeline_mode = #tpu.pipeline_mode<synchronous>, transform_indices = @transform_1, window_bounds = array<i64: 32, 128>}, {pipeline_mode = #tpu.pipeline_mode<synchronous>, transform_indices = @transform_2, window_bounds = array<i64: 1, 128>}, {transform_indices = @transform_3, window_bounds = array<i64: 8, 256>}]} {
    %c0 = arith.constant 0 : index
    %c0_0 = arith.constant 0 : index
    %0 = vector.load %arg1[%c0, %c0_0] : memref<8x32xf32, #tpu.memory_space<vmem>>, vector<8x32xf32>
    %cst = arith.constant 0.000000e+00 : f32
    %1 = vector.broadcast %cst : f32 to vector<8x32xf32>
    %2 = arith.subf %0, %1 : vector<8x32xf32>
    %c0_1 = arith.constant 0 : index
    %c0_2 = arith.constant 0 : index
    %3 = vector.load %arg2[%c0_1, %c0_2] : memref<32x128xf32, #tpu.memory_space<vmem>>, vector<32x128xf32>
    %cst_3 = arith.constant dense<0.000000e+00> : vector<8x128xf32>
    %4 = tpu.matmul %2, %3, %cst_3 {dimension_numbers = #tpu.dot_dimension_numbers<[1], [0], [0], [1], [0, 0, 1, 1], [], []>} : vector<8x32xf32>, vector<32x128xf32>, vector<8x128xf32> -> vector<8x128xf32>
    %c0_4 = arith.constant 0 : index
    %c0_5 = arith.constant 0 : index
    %5 = vector.load %arg3[%c0_4, %c0_5] : memref<1x128xf32, #tpu.memory_space<vmem>>, vector<1x128xf32>
    %6 = vector.broadcast %5 : vector<1x128xf32> to vector<8x128xf32>
    %7 = arith.subf %4, %6 : vector<8x128xf32>
    %cst_6 = arith.constant -1.000000e+00 : f32
    %cst_7 = arith.constant 0.000000e+00 : f32
    %8 = vector.broadcast %cst_6 : f32 to vector<8x128xf32>
    %9 = arith.maximumf %8, %7 : vector<8x128xf32>
    %10 = vector.broadcast %cst_7 : f32 to vector<8x128xf32>
    %11 = arith.minimumf %10, %9 : vector<8x128xf32>
    %c0_8 = arith.constant 0 : index
    %c0_9 = arith.constant 0 : index
    %12 = vector.load %arg4[%c0_8, %c0_9] : memref<8x256xf32, #tpu.memory_space<vmem>>, vector<8x128xf32>
    tpu.vector_store %arg4[%c0_8, %c0_9], %11 {strides = array<i32>} : memref<8x256xf32, #tpu.memory_space<vmem>>, vector<8x128xf32>,
    %cst_10 = arith.constant 0.000000e+00 : f32
    %13 = vector.broadcast %cst_10 : f32 to vector<8x128xf32>
    %14 = arith.subf %13, %7 : vector<8x128xf32>
    %cst_11 = arith.constant -1.000000e+00 : f32
    %cst_12 = arith.constant 0.000000e+00 : f32
    %15 = vector.broadcast %cst_11 : f32 to vector<8x128xf32>
    %16 = arith.maximumf %15, %14 : vector<8x128xf32>
    %17 = vector.broadcast %cst_12 : f32 to vector<8x128xf32>
    %18 = arith.minimumf %17, %16 : vector<8x128xf32>
    %c0_13 = arith.constant 0 : index
    %c128 = arith.constant 128 : index
    %19 = vector.load %arg4[%c0_13, %c128] : memref<8x256xf32, #tpu.memory_space<vmem>>, vector<8x128xf32>
    tpu.vector_store %arg4[%c0_13, %c128], %18 {strides = array<i32>} : memref<8x256xf32, #tpu.memory_space<vmem>>, vector<8x128xf32>,
    return
  }
  func.func @transform_0(%arg0: i32) -> (i32, i32) {
    %c0_i32 = arith.constant 0 : i32
    %c0_i32_0 = arith.constant 0 : i32
    return %arg0, %c0_i32 : i32, i32
  }
  func.func @transform_1(%arg0: i32) -> (i32, i32) {
    %c0_i32 = arith.constant 0 : i32
    %c0_i32_0 = arith.constant 0 : i32
    %c0_i32_1 = arith.constant 0 : i32
    return %c0_i32, %c0_i32_0 : i32, i32
  }
  func.func @transform_2(%arg0: i32) -> (i32, i32) {
    %c0_i32 = arith.constant 0 : i32
    %c0_i32_0 = arith.constant 0 : i32
    %c0_i32_1 = arith.constant 0 : i32
    return %c0_i32, %c0_i32_0 : i32, i32
  }
  func.func @transform_3(%arg0: i32) -> (i32, i32) {
    %c0_i32 = arith.constant 0 : i32
    %c0_i32_0 = arith.constant 0 : i32
    return %arg0, %c0_i32 : i32, i32
  }
}

</mosaic_0001>

<bundles_post_ra>
// kernel: tpu_custom_call.1
= control target key start
LH: loop header
LB: loop body
LE: loop exit
PB: predicated region body
PF: predicated region fallthrough
CT: control target
= control target key end

     0   :  { %8 = vsyncpa [#allocation3], 0  ;;  %s850_s0 = inlined_call_operand.hbm [shape: f32[16,32], index: 0, kind: input, shape index: {}]   ;;  %s851_s1 = inlined_call_operand.hbm [shape: f32[32,128], index: 1, kind: input, shape index: {}]   ;;  %s852_s2 = inlined_call_operand.vmem [shape: f32[1,128], index: 2, kind: input, shape index: {}]   ;;  %s853_s3 = inlined_call_operand.hbm [shape: f32[16,256], index: 3, kind: output, shape index: {}]  }
   0x1   :  { %10 = vsyncpa [#allocation3 + $0x1], 0 }
   0x2   :  { %11 = vsyncpa [#allocation6], 0 }
   0x3   :  { %12 = vsyncpa [#allocation4], 0 }
   0x4   :  { %14 = vsyncpa [#allocation4 + $0x1], 0  ;;  %s650_s12 = smov 0   ;;  %s652_s13 = smov 0  }
   0x5   :  { %s654_s14 = smov 0   ;;  %s656_s15 = smov 0  }
   0x6 LB: > { %s671_s16 = sadd.s32 4294967295, %s620_s15   ;;  %s390_s17 = sadd.s32 4294967294, %s620_s15   ;;  %s620_s15 = sphi %s656_s15, %s873_s15   ;;  %s616_s14 = sphi %s654_s14, %s872_s14   ;;  %s612_s13 = sphi %s652_s13, %s871_s13   ;;  %s608_s12 = sphi %s650_s12, %s870_s12  }
   0x7   : > { %p40_p0 = scmp.ne.s32.totalorder %s612_s13, %s608_s12  ;;  %p854_p1 = scmp.eq.s32.totalorder %s671_s16, 0 }
   0x8   : > { %p112_p3 = scmp.eq.s32.totalorder %s390_s17, 1  ;;  %p391_p5 = scmp.ge.s32.totalorder %s620_s15, 1 }
   0x9   : > { %p680_p4 = por %p854_p1, %p40_p0  ;;  %p119_p7 = scmp.lt.s32.totalorder %s620_s15, 3 }
   0xa   : > { %p685_p6 = por %p112_p3, %p40_p0  ;;  %s622_s21 = smov [#allocation5]  }
   0xb   : > { %s857_s18 = scalar_select %p680_p4, 1, 0 }
   0xc   : > { %s858_s19 = scalar_select %p685_p6, 1, 0 }
   0xd   : > { %p690_p8 = pnand %p391_p5, %p119_p7  ;;  %s131_s22 = sshll.u32 %s622_s21, 4  ;;  %s694_s22 = int_to_ptr.vmem [resolvable:$true] %s131_s22 }
   0xe   : > { %s706_s24 = sadd.s32 1, %s620_s15   ;;  %s27_s25 = sadd.s32 1, %s616_s14 }
   0xf   : > { %s859_s20 = scalar_select %p690_p8, 1, 0 }
  0x10   : > { %p438_p9 = pneg %p690_p8  ;;  %s24_s26 = ssub.s32 %s620_s15, %s706_s24 }
  0x11   : > { %s492_s29 = scalar_lea.hbm %s851_s1, 512 }
  0x12   : > { %p701_p11 = pnand %p438_p9, %p854_p1  ;;  %p493_p12 = scmp.ne.s32.totalorder %s851_s1, %s492_s29 }
  0x13   : > { %p499_p5 = scmp.lt.u32.totalorder %s492_s29, %s851_s1 }
  0x14   : > { %p494_p13 = pneg %p701_p11 }
  0x16   : > { %p495_p0 = pnand %p494_p13, %p493_p12 }
  0x18   : > { %p496_p3 = pneg %p495_p0 }
  0x1a   : > { %p501_p7 = pnand %p499_p5, %p496_p3 }
  0x1c   : > { %504 = shalt.err (!%p501_p7)
}
  0x1d   : > { %s505_s7 = scalar_lea.vmem %s694_s22, 512  ;;  %p513_p2 = scmp.lt.s32.totalorder %s694_s22, %s694_s22 }
  0x1e   : > { %p506_p9 = scmp.ne.s32.totalorder %s694_s22, %s505_s7  ;;  %p514_p6 = scmp.lt.s32.totalorder %s505_s7, %s505_s7 }
  0x20   : > { %p508_p10 = pnand %p506_p9, %p494_p13  ;;  %p515_p4 = por %p514_p6, %p513_p2 }
  0x22   : > { %p509_p1 = pneg %p508_p10 }
  0x24   : > { %p516_p8 = pnand %p515_p4, %p509_p1 }
  0x26   : > { %519 = shalt.err (!%p516_p8)
}
  0x27   : > { %s623_s8 = smov 128   ;;  %s624_s9 = smov 8  }
  0x28   : > { %441 = dma.hbm_to_vmem [thread:$0]  (!%p701_p11), %s851_s1, 512, %s694_s22, [#allocation6], %s623_s8, %s623_s8, %s624_s9  }
  0x29   : > { %p25_p2 = scmp.eq.s32.totalorder %s24_s26, 0  ;;  %p34_p1 = scmp.ne.s32.totalorder %s616_s14, %s612_s13 }
  0x2a   : > { %p35_p4 = scmp.eq.s32.totalorder %s620_s15, 0  ;;  %p451_p6 = scmp.lt.s32.totalorder %s620_s15, 2 }
  0x2b   : > { %s737_s17 = scalar_select %p25_p2, %s616_s14, %s27_s25  }
  0x2c   : > { %p36_p8 = por %p35_p4, %p34_p1  ;;  %p861_p10 = scmp.eq.s32.totalorder %s671_s16, 1 }
  0x2d   : > { %s148_s27 = sand.u32 1, %s616_s14   ;;  %s395_s28 = sshll.u32 %s620_s15, 7 }
  0x2e   : > { %p741_p12 = por %p861_p10, %p34_p1  ;;  %s394_s29 = sshll.u32 %s148_s27, 3 }
  0x2f   : > { %s750_s4 = scalar_lea.hbm %s850_s0, %s395_s28  ;;  %s152_s22 = scalar_lea.vmem [#allocation2], %s394_s29 }
  0x30   : > { %s159_s25 = sshll.u32 %s152_s22, 4  ;;  %p752_p11 = pnand %p451_p6, %p36_p8  ;;  %s756_s25 = int_to_ptr.vmem [resolvable:$true] %s159_s25 }
  0x31   : > { %s149_s5 = scalar_lea.sflag [#allocation3], %s148_s27  ;;  %s520_s6 = scalar_lea.hbm %s750_s4, 128 }
  0x32   : > { %p521_p13 = scmp.ne.s32.totalorder %s750_s4, %s520_s6  ;;  %p522_p0 = pneg %p752_p11 }
  0x33   : > { %s525_s9 = scalar_lea.hbm %s850_s0, 256  ;;  %p526_p7 = scmp.lt.u32.totalorder %s750_s4, %s850_s0 }
  0x34   : > { %p523_p3 = pnand %p522_p0, %p521_p13  ;;  %p527_p9 = scmp.lt.u32.totalorder %s525_s9, %s520_s6 }
  0x35   : > { %p529_p1 = scmp.lt.u32.totalorder %s520_s6, %s750_s4 }
  0x36   : > { %p524_p5 = pneg %p523_p3  ;;  %p528_p2 = por %p527_p9, %p526_p7 }
  0x38   : > { %p530_p4 = por %p529_p1, %p528_p2 }
  0x3a   : > { %p531_p6 = pnand %p530_p4, %p524_p5 }
  0x3c   : > { %534 = shalt.err (!%p531_p6)
}
  0x3d   : > { %s535_s27 = scalar_lea.vmem %s756_s25, 128  ;;  %s625_s28 = smov [#allocation2]  }
  0x3e   : > { %p536_p8 = scmp.ne.s32.totalorder %s756_s25, %s535_s27  ;;  %s540_s29 = sshll.u32 %s625_s28, 4  ;;  %s541_s29 = int_to_ptr.vmem [resolvable:$false] %s540_s29 }
  0x3f   : > { %s542_s23 = scalar_lea.vmem %s541_s29, 256  ;;  %p543_p3 = scmp.lt.s32.totalorder %s756_s25, %s541_s29 }
  0x40   : > { %p538_p10 = pnand %p536_p8, %p522_p0  ;;  %p544_p7 = scmp.lt.s32.totalorder %s542_s23, %s535_s27 }
  0x42   : > { %p539_p13 = pneg %p538_p10  ;;  %p545_p9 = por %p544_p7, %p543_p3 }
  0x44   : > { %p546_p2 = pnand %p545_p9, %p539_p13 }
  0x46   : > { %549 = shalt.err (!%p546_p2)
}
  0x47   : > { %445 = dma.hbm_to_vmem [thread:$0]  (!%p752_p11), %s750_s4, 128, %s756_s25, %s149_s5  }
  0x48   : > { %p864_p5 = scmp.ne.s32.totalorder %s859_s20, 0 }
  0x49   : > { %s786_s30 = sand.u32 (!%p864_p5), 1, %s612_s13   ;;  %p865_p0 = scmp.ne.s32.totalorder (!%p864_p5), %s857_s18, 0 }
  0x4a   : > { %168 = sbr.rel (%p864_p5) target bundleno = 329 (0x149), region = 32  ;;  %s397_s22 = sshll.u32 (!%p864_p5), %s786_s30, 3 }
  0x4b   : > { %s171_s6 = scalar_lea.sflag (!%p864_p5), [#allocation3], %s786_s30  ;;  %s174_s7 = scalar_lea.vmem (!%p864_p5), [#allocation2], %s397_s22 }
  0x51   : > { %595 = dma.done.wait (%p865_p0), %s171_s6, 128  }
  0x52   : > { %597 = vsyncadd (%p865_p0), %s171_s6, 4294967168  ;;  %p866_p1 = scmp.eq.s32.totalorder %s671_s16, 0 }
  0x54   : > { %599 = dma.done.wait (%p866_p1), [#allocation6], 512   ;;  %p867_p11 = pmov %p866_p1 }
  0x55   : > { %v626_v0 = vmov 0.0|0.0   ;;  %vm627_vm0 = vmmov 0   ;;  %v628_v1 = vmov 0.0   ;;  %v202_v2 = vld [vmem:[#allocation5] sm:$0xff]  ;;  %v203_v3 = vld [vmem:[#allocation5 + $0x8] sm:$0xff]  ;;  %v204_v4 = vld [vmem:[#allocation5 + $0x10] sm:$0xff] }
  0x56   : > { %601 = vsyncadd (%p867_p11), [#allocation6], 4294966784  ;;  %424 = vmatprep.subr.bf16.mxu0 %v626_v0  ;;  %421 = vmatprep.mubr.msk.f32.mxu0 %vm627_vm0, %v628_v1  ;;  %v425_v5 = vpack.c.bf16 %v203_v3, %v202_v2  ;;  %v205_v6 = vld [vmem:[#allocation5 + $0x18] sm:$0xff]  ;;  %vm206_vm1 = vcmask 261120   ;;  %s399_s18 = sshll.u32 %s786_s30, 4  ;;  %s407_s25 = sshll.u32 %s671_s16, 8 }
  0x57   : > { %v428_v7 = vpack.c.bf16 %v205_v6, %v204_v4  ;;  %v201_v8 = vld [vmem:[%s174_s7] sm:$0xff]  ;;  %s200_s26 = scalar_lea.vmem [#allocation7], %s399_s18  ;;  %s806_s10 = scalar_lea.hbm %s853_s3, %s407_s25 }
  0x58   : > { %426 = vmatpush3.bf16.msra.mxu0 %v425_v5  ;;  %v401_v9 = vld [vmem:[%s852_s2] ss:$0 sm:$0xff]  ;;  %s310_s5 = sshll.u32 %s200_s26, 4  ;;  %s296_s11 = scalar_lea.sflag [#allocation4], %s786_s30  ;;  %s808_s5 = int_to_ptr.vmem [resolvable:$true] %s310_s5 }
  0x59   : > { %427 = vmatprep.subr.bf16.mxu0 %v626_v0  ;;  %s550_s27 = scalar_lea.vmem %s808_s5, 256  ;;  %s629_s16 = smov [#allocation7]  }
  0x5a   : > { %p551_p4 = scmp.ne.s32.totalorder %s808_s5, %s550_s27  ;;  %s554_s28 = sshll.u32 %s629_s16, 4  ;;  %s555_s28 = int_to_ptr.vmem [resolvable:$false] %s554_s28 }
  0x5b   : > { %s556_s29 = scalar_lea.vmem %s555_s28, 512  ;;  %p557_p10 = scmp.lt.s32.totalorder %s808_s5, %s555_s28 }
  0x5c   : > { %429 = vmatpush3.bf16.msra.mxu0 %v428_v7  ;;  %p552_p6 = pnand %p551_p4, %p741_p12  ;;  %p558_p13 = scmp.lt.s32.totalorder %s556_s29, %s550_s27 }
  0x5e   : > { %p553_p8 = pneg %p552_p6  ;;  %p559_p3 = por %p558_p13, %p557_p10 }
  0x5f   : > { %422 = vmatmul.mubr.msk.f32.vlgmr.msra.gmra.mrb[0].mxu0 %vm206_vm1, %v201_v8 }
  0x60   : > { %p560_p7 = pnand %p559_p3, %p553_p8 }
 0x132   : > { %v276_v10 = vpop.f32.mrb[0].mxu0 }
 0x133   : > { %v287_v11 = vsub.f32 %v276_v10, %v401_v9  ;;  %v423_v12 = vpop.f32.mrb[1].mxu0 }
 0x135   : > { %v288_v13 = vmax.f32 %v287_v11, -1.0  ;;  %v291_v14 = vsub.f32 0.0, %v287_v11 }
 0x137   : > { %v289_v15 = vmin.f32 %v288_v13, 0.0  ;;  %v292_v16 = vmax.f32 %v291_v14, -1.0 }
 0x139   : > { %290 = vst [vmem:[%s200_s26] sm:$0xff] %v289_v15  ;;  %v293_v17 = vmin.f32 %v292_v16, 0.0 }
 0x13b   : > { %294 = vst [vmem:[%s200_s26 + $0x8] sm:$0xff] %v293_v17 }
 0x13c   : > { %563 = shalt.err (!%p560_p7)
}
 0x13d   : > { %s564_s23 = scalar_lea.hbm %s806_s10, 256  ;;  %s568_s6 = scalar_lea.hbm %s853_s3, 512 }
 0x13e   : > { %p565_p9 = scmp.ne.s32.totalorder %s806_s10, %s564_s23  ;;  %p569_p0 = scmp.lt.u32.totalorder %s806_s10, %s853_s3 }
 0x13f   : > { %p570_p1 = scmp.lt.u32.totalorder %s568_s6, %s564_s23  ;;  %p572_p4 = scmp.lt.u32.totalorder %s564_s23, %s806_s10 }
 0x140   : > { %p566_p2 = pnand %p565_p9, %p741_p12 }
 0x141   : > { %p571_p11 = por %p570_p1, %p569_p0 }
 0x142   : > { %p567_p5 = pneg %p566_p2 }
 0x143   : > { %p573_p6 = por %p572_p4, %p571_p11 }
 0x145   : > { %p574_p8 = pnand %p573_p6, %p567_p5 }
 0x147   : > { %577 = shalt.err (!%p574_p8)
}
 0x148   : > { %436 = dma.vmem_to_hbm [thread:$0]  (%p741_p12), %s808_s5, 256, %s806_s10, %s296_s11  }
 0x149 PF: > { %s322_s20 = sand.u32 1, %s608_s12   ;;  %p868_p10 = scmp.ne.s32.totalorder %s858_s19, 0 }
 0x14a   : > { %p869_p13 = scmp.ge.s32.totalorder %s620_s15, 2  ;;  %s323_s4 = scalar_lea.sflag [#allocation4], %s322_s20 }
 0x14c   : > { %p447_p3 = pnand %p869_p13, %p868_p10 }
 0x14e   : > { %603 = dma.done.wait (!%p447_p3), %s323_s4, 256  }
 0x14f   : > { %605 = vsyncadd (!%p447_p3), %s323_s4, 4294967040  ;;  %p17_p7 = scmp.ge.s32.totalorder %s706_s24, 4   ;;  %s870_s12 = smov %s612_s13 }
 0x150   : > { %s871_s13 = smov %s616_s14  ;;  %s872_s14 = smov %s737_s17 }
 0x151   : > { %s873_s15 = smov %s706_s24  ;;  %19 = sbr.rel (!%p17_p7) target bundleno = 6 (0x6), region = 81 }
 0x158   :  { %328 = vsyncpa [#allocation3], 1 }
 0x159   :  { %330 = vsyncpa [#allocation3 + $0x1], 1 }
 0x15a   :  { %331 = vsyncpa [#allocation6], 1 }
 0x15b   :  { %332 = vsyncpa [#allocation4], 1 }
 0x15c   :  { %334 = vsyncpa [#allocation4 + $0x1], 1 }

</bundles_post_ra>
